<compile_context>
chip_gen: v7x
topology: tpu7x:2x2x1
jax: 0.10.0
libtpu: 0.0.40
codegen_flags: <defaults>
</compile_context>

<pallas_src>
import functools

import numpy as np
import jax
import jax.numpy as jnp
from jax import lax
from jax.experimental import pallas as pl
from jax.experimental.pallas import tpu as pltpu


def _softattn_kernel(x_ref, o_ref, *, d, alpha, beta, discretization):
    # x_ref: (1, D, T) input dtype      o_ref: (1, 1, T) input dtype
    x = x_ref[0].astype(jnp.float32)                      # (D, T)

    # Numerically stable softmax pieces over the depth-bin (sublane) axis.
    m = jnp.max(x, axis=0, keepdims=True)                 # (1, T)
    e = jnp.exp(x - m)                                    # (D, T)

    # Depth-bin grid as a (D, 1) column; lane-broadcast in the multiply below.
    k = lax.broadcasted_iota(jnp.int32, (d, 1), 0).astype(jnp.float32)
    if discretization == "SID":
        g = jnp.exp(np.float32(np.log(alpha))
                    + np.float32(np.log(beta / alpha) / d) * k)
    else:  # 'SOD' -> linspace(alpha, beta, D)
        step = (beta - alpha) / max(d - 1, 1)
        g = np.float32(alpha) + np.float32(step) * k

    num = jnp.sum(e * g, axis=0, keepdims=True)           # (1, T)
    den = jnp.sum(e, axis=0, keepdims=True)               # (1, T)
    out = num * pl.reciprocal(den, approx=False)          # (1, T)
    o_ref[0] = out.astype(o_ref.dtype)


def soft_attn_depth(x, alpha=0.01, beta=1.0, discretization="SOD", lane_tile=2048):
    """x: (B, D, H, W) -> (B, 1, H, W), same dtype as x (f32 accumulation inside)."""
    assert lane_tile % 128 == 0, "lane_tile must be a multiple of 128"
    B, D, H, W = x.shape
    HW = H * W

    x_flat = x.reshape(B, D, HW)          # trailing-dim merge: no data movement

    # Lane tile: full HW for small images (legal even if HW % 128 != 0),
    # otherwise a lane-dense multiple of 128; last partial tile is masked.
    if HW <= lane_tile:
        T = HW
        num_tiles = 1
    else:
        T = lane_tile
        num_tiles = pl.cdiv(HW, T)

    kernel = functools.partial(
        _softattn_kernel,
        d=D,
        alpha=float(alpha),
        beta=float(beta),
        discretization=discretization,
    )

    out = pl.pallas_call(
        kernel,
        out_shape=jax.ShapeDtypeStruct((B, 1, HW), x.dtype),
        grid_spec=pltpu.PrefetchScalarGridSpec(
            num_scalar_prefetch=0,
            grid=(B, num_tiles),
            in_specs=[pl.BlockSpec((1, D, T), lambda b, t: (b, 0, t))],
            out_specs=pl.BlockSpec((1, 1, T), lambda b, t: (b, 0, t)),
        ),
        compiler_params=pltpu.CompilerParams(
            dimension_semantics=("parallel", "parallel"),
        ),
    )(x_flat)

    return out.reshape(B, 1, H, W)


def _reference(x, alpha=0.01, beta=1.0, discretization="SID" if False else "SOD"):
    # pure-JAX reference of the PyTorch forward
    B, D, H, W = x.shape
    if discretization == "SID":
        k = np.arange(D, dtype=np.float32)
        grid = np.exp(np.log(alpha) + np.log(beta / alpha) * k / D).astype(np.float32)
    else:
        grid = np.linspace(alpha, beta, D, dtype=np.float32)
    grid = jnp.asarray(grid).reshape(1, D, 1, 1)
    z = jax.nn.softmax(x.astype(jnp.float32), axis=1)
    z = z * grid
    return jnp.sum(z, axis=1, keepdims=True)


if __name__ == "__main__":
    key = jax.random.PRNGKey(0)
    B, D, H, W = 2, 16, 16, 16          # B=batch, D=depth bins (softmax dim), HxW spatial
    x = jax.random.normal(key, (B, D, H, W), dtype=jnp.float32)

    # 1) default path (single lane tile, SOD/linspace)
    out = jax.block_until_ready(soft_attn_depth(x, alpha=0.01, beta=1.0))
    ref = _reference(x, alpha=0.01, beta=1.0)
    assert out.shape == (B, 1, H, W)
    np.testing.assert_allclose(np.asarray(out), np.asarray(ref), rtol=1e-5, atol=1e-6)

    # 2) exercise the lane-tiled path (grid = (B, 2))
    out_t = jax.block_until_ready(soft_attn_depth(x, alpha=0.01, beta=1.0, lane_tile=128))
    np.testing.assert_allclose(np.asarray(out_t), np.asarray(ref), rtol=1e-5, atol=1e-6)

    # 3) unaligned depth dim (D=12, no padding needed) + SID discretization
    x12 = jax.random.normal(jax.random.PRNGKey(1), (B, 12, H, W), dtype=jnp.float32)
    out_p = jax.block_until_ready(
        soft_attn_depth(x12, alpha=0.01, beta=1.0, discretization="SID"))
    ref_p = _reference(x12, alpha=0.01, beta=1.0, discretization="SID")
    np.testing.assert_allclose(np.asarray(out_p), np.asarray(ref_p), rtol=1e-5, atol=1e-6)

    # 4) non-divisible lane tiling (HW=400, T=128 -> masked partial last tile)
    x_odd = jax.random.normal(jax.random.PRNGKey(2), (B, D, 20, 20), dtype=jnp.float32)
    out_o = jax.block_until_ready(
        soft_attn_depth(x_odd, alpha=0.01, beta=1.0, lane_tile=128))
    ref_o = _reference(x_odd, alpha=0.01, beta=1.0)
    np.testing.assert_allclose(np.asarray(out_o), np.asarray(ref_o), rtol=1e-5, atol=1e-6)

    print("KERNEL_OK")
</pallas_src>

<mosaic_0001>
module attributes {stable_mosaic.version = 11 : i64} {
  func.func @_softattn_kernel(%arg0: i32, %arg1: i32, %arg2: memref<1x16x256xf32, #tpu.memory_space<vmem>>, %arg3: memref<1x1x256xf32, #tpu.memory_space<vmem>>) attributes {dimension_semantics = [#tpu.dimension_semantics<parallel>, #tpu.dimension_semantics<parallel>], iteration_bounds = array<i64: 2, 1>, scalar_prefetch = 0 : i64, scratch_operands = 0 : i64, tpu.core_type = #tpu.core_type<tc>, window_params = [{transform_indices = @transform_0, window_bounds = array<i64: 1, 16, 256>}, {transform_indices = @transform_1, window_bounds = array<i64: 1, 1, 256>}]} {
    %c0 = arith.constant 0 : index
    %c0_0 = arith.constant 0 : index
    %c0_1 = arith.constant 0 : index
    %0 = vector.load %arg2[%c0, %c0_0, %c0_1] : memref<1x16x256xf32, #tpu.memory_space<vmem>>, vector<1x16x256xf32>
    %1 = vector.shape_cast %0 : vector<1x16x256xf32> to vector<16x256xf32>
    %cst = arith.constant dense<0xFF800000> : vector<256xf32>
    %2 = vector.multi_reduction <maximumf>, %1, %cst [0] : vector<16x256xf32> to vector<256xf32>
    %3 = vector.shape_cast %2 : vector<256xf32> to vector<1x256xf32>
    %4 = vector.broadcast %3 : vector<1x256xf32> to vector<16x256xf32>
    %5 = arith.subf %1, %4 : vector<16x256xf32>
    %6 = math.exp %5 : vector<16x256xf32>
    %7 = tpu.iota {dimensions = array<i32: 0>} : vector<16x1xi32>
    %8 = arith.sitofp %7 : vector<16x1xi32> to vector<16x1xf32>
    %cst_2 = arith.constant 6.600000e-02 : f32
    %9 = vector.broadcast %cst_2 : f32 to vector<16x1xf32>
    %10 = arith.mulf %9, %8 : vector<16x1xf32>
    %cst_3 = arith.constant 0.00999999977 : f32
    %11 = vector.broadcast %cst_3 : f32 to vector<16x1xf32>
    %12 = arith.addf %11, %10 : vector<16x1xf32>
    %13 = vector.broadcast %12 : vector<16x1xf32> to vector<16x256xf32>
    %14 = arith.mulf %6, %13 : vector<16x256xf32>
    %cst_4 = arith.constant dense<0.000000e+00> : vector<256xf32>
    %15 = vector.multi_reduction <add>, %14, %cst_4 [0] : vector<16x256xf32> to vector<256xf32>
    %16 = vector.shape_cast %15 : vector<256xf32> to vector<1x256xf32>
    %cst_5 = arith.constant dense<0.000000e+00> : vector<256xf32>
    %17 = vector.multi_reduction <add>, %6, %cst_5 [0] : vector<16x256xf32> to vector<256xf32>
    %18 = vector.shape_cast %17 : vector<256xf32> to vector<1x256xf32>
    %19 = tpu.reciprocal %18 : vector<1x256xf32> -> vector<1x256xf32>
    %20 = arith.mulf %16, %19 : vector<1x256xf32>
    %c0_6 = arith.constant 0 : index
    %c0_7 = arith.constant 0 : index
    %c0_8 = arith.constant 0 : index
    %21 = vector.load %arg3[%c0_6, %c0_7, %c0_8] : memref<1x1x256xf32, #tpu.memory_space<vmem>>, vector<1x1x256xf32>
    %22 = vector.shape_cast %21 : vector<1x1x256xf32> to vector<1x256xf32>
    %23 = vector.shape_cast %20 : vector<1x256xf32> to vector<1x1x256xf32>
    tpu.vector_store %arg3[%c0_6, %c0_7, %c0_8], %23 {strides = array<i32>} : memref<1x1x256xf32, #tpu.memory_space<vmem>>, vector<1x1x256xf32>,
    return
  }
  func.func @transform_0(%arg0: i32, %arg1: i32) -> (i32, i32, i32) {
    %c0_i32 = arith.constant 0 : i32
    %c0_i32_0 = arith.constant 0 : i32
    return %arg0, %c0_i32, %arg1 : i32, i32, i32
  }
  func.func @transform_1(%arg0: i32, %arg1: i32) -> (i32, i32, i32) {
    %c0_i32 = arith.constant 0 : i32
    %c0_i32_0 = arith.constant 0 : i32
    return %arg0, %c0_i32, %arg1 : i32, i32, i32
  }
}

</mosaic_0001>

<bundles_post_ra>
// kernel: tpu_custom_call.1
= control target key start
LH: loop header
LB: loop body
LE: loop exit
PB: predicated region body
PF: predicated region fallthrough
CT: control target
= control target key end

     0   :  { %6 = vsyncpa [#allocation3], 0  ;;  %s758_s0 = inlined_call_operand.hbm [shape: f32[2,16,256], index: 0, kind: input, shape index: {}]   ;;  %s759_s1 = inlined_call_operand.hbm [shape: f32[2,1,256], index: 1, kind: output, shape index: {}]  }
   0x1   :  { %8 = vsyncpa [#allocation3 + $0x1], 0 }
   0x2   :  { %9 = vsyncpa [#allocation4], 0 }
   0x3   :  { %11 = vsyncpa [#allocation4 + $0x1], 0  ;;  %s577_s6 = smov 0   ;;  %s579_s7 = smov 0  }
   0x4   :  { %s581_s8 = smov 0   ;;  %s583_s9 = smov 0  }
   0x5   :  { %s585_s10 = smov 0   ;;  %s587_s11 = smov 0  }
   0x6 LB: > { %s354_s12 = sadd.s32 4294967295, %s560_s11   ;;  %s355_s13 = sadd.s32 4294967294, %s560_s11   ;;  %s560_s11 = sphi %s587_s11, %s17_s11   ;;  %s556_s10 = sphi %s585_s10, %s774_s10   ;;  %s552_s9 = sphi %s583_s9, %s773_s9   ;;  %s548_s8 = sphi %s581_s8, %s772_s8   ;;  %s544_s7 = sphi %s579_s7, %s771_s7   ;;  %s540_s6 = sphi %s577_s6, %s770_s6  }
   0x7   : > { %s29_s14 = sadd.s32 1, %s556_s10  ;;  %s38_s15 = sadd.s32 1, %s548_s8 }
   0x8   : > { %p31_p0 = scmp.ge.s32.totalorder %s29_s14, 2  ;;  %p45_p1 = scmp.ne.s32.totalorder %s548_s8, %s544_s7 }
   0x9   : > { %p46_p2 = scmp.eq.s32.totalorder %s560_s11, 0  ;;  %p51_p3 = scmp.ne.s32.totalorder %s544_s7, %s540_s6 }
   0xa   : > { %s776_s14 = smov (%p31_p0, %s29_s14), 0  ;;  %p52_p5 = scmp.eq.s32.totalorder %s354_s12, 0 }
   0xb   : > { %p618_p4 = por %p46_p2, %p45_p1  ;;  %s33_s17 = ssub.s32 %s556_s10, %s776_s14 }
   0xc   : > { %p77_p6 = scmp.eq.s32.totalorder %s354_s12, 1  ;;  %p36_p7 = scmp.eq.s32.totalorder %s33_s17, 0 }
   0xd   : > { %p624_p8 = por %p52_p5, %p51_p3  ;;  %p83_p10 = scmp.eq.s32.totalorder %s355_s13, 1 }
   0xe   : > { %p628_p9 = por %p77_p6, %p45_p1  ;;  %p383_p13 = scmp.lt.s32.totalorder %s560_s11, 2 }
   0xf   : > { %s633_s20 = scalar_select %p36_p7, %s548_s8, %s38_s15  }
  0x10   : > { %s763_s19 = scalar_select %p628_p9, 1, 0 }
  0x11   : > { %p635_p11 = por %p83_p10, %p51_p3  ;;  %s103_s22 = sand.u32 1, %s548_s8  }
  0x12   : > { %s358_s23 = sshll.u32 %s103_s22, 5  ;;  %s369_s24 = sshll.u32 %s556_s10, 9 }
  0x13   : > { %s764_s21 = scalar_select %p635_p11, 1, 0 }
  0x14   : > { %s646_s27 = scalar_lea.hbm %s758_s0, %s369_s24  ;;  %s107_s28 = scalar_lea.vmem [#allocation2], %s358_s23 }
  0x15   : > { %s116_s29 = sshll.u32 %s107_s28, 4  ;;  %p652_p0 = pnand %p383_p13, %p618_p4  ;;  %s648_s29 = int_to_ptr.vmem [resolvable:$true] %s116_s29 }
  0x16   : > { %s657_s2 = scalar_lea.sflag [#allocation3], %s103_s22  ;;  %s448_s3 = scalar_lea.hbm %s646_s27, 512 }
  0x17   : > { %p449_p2 = scmp.ne.s32.totalorder %s646_s27, %s448_s3  ;;  %p450_p3 = pneg %p652_p0 }
  0x18   : > { %s453_s12 = scalar_lea.hbm %s758_s0, 1024  ;;  %p454_p4 = scmp.lt.u32.totalorder %s646_s27, %s758_s0 }
  0x19   : > { %p451_p5 = pnand %p450_p3, %p449_p2  ;;  %p455_p7 = scmp.lt.u32.totalorder %s453_s12, %s448_s3 }
  0x1a   : > { %p457_p13 = scmp.lt.u32.totalorder %s448_s3, %s646_s27 }
  0x1b   : > { %p452_p6 = pneg %p451_p5  ;;  %p456_p10 = por %p455_p7, %p454_p4 }
  0x1d   : > { %p458_p12 = por %p457_p13, %p456_p10 }
  0x1f   : > { %p459_p1 = pnand %p458_p12, %p452_p6 }
  0x21   : > { %462 = shalt.err (!%p459_p1)
}
  0x22   : > { %s463_s16 = scalar_lea.vmem %s648_s29, 512  ;;  %s562_s17 = smov [#allocation2]  }
  0x23   : > { %p464_p2 = scmp.ne.s32.totalorder %s648_s29, %s463_s16  ;;  %s468_s22 = sshll.u32 %s562_s17, 4  ;;  %s469_s22 = int_to_ptr.vmem [resolvable:$false] %s468_s22 }
  0x24   : > { %s470_s23 = scalar_lea.vmem %s469_s22, 1024  ;;  %p471_p9 = scmp.lt.s32.totalorder %s648_s29, %s469_s22 }
  0x25   : > { %p466_p5 = pnand %p464_p2, %p450_p3  ;;  %p472_p4 = scmp.lt.s32.totalorder %s470_s23, %s463_s16 }
  0x27   : > { %p467_p11 = pneg %p466_p5  ;;  %p473_p7 = por %p472_p4, %p471_p9 }
  0x29   : > { %p474_p10 = pnand %p473_p7, %p467_p11 }
  0x2b   : > { %477 = shalt.err (!%p474_p10)
}
  0x2c   : > { %s563_s24 = smov 256   ;;  %s564_s25 = smov 16  }
  0x2d   : > { %378 = dma.hbm_to_vmem [thread:$0]  (!%p652_p0), %s646_s27, 512, %s648_s29, %s657_s2, %s563_s24, %s563_s24, %s564_s25  }
  0x2e   : > { %p124_p12 = scmp.lt.s32.totalorder %s560_s11, 3  ;;  %p766_p1 = scmp.ge.s32.totalorder %s560_s11, 1 }
  0x30   : > { %p125_p3 = pnand %p766_p1, %p124_p12 }
  0x31   : > { %s689_s26 = sand.u32 (!%p125_p3), 1, %s544_s7  }
  0x32   : > { %128 = sbr.rel (%p125_p3) target bundleno = 139 (0x8b), region = 24  ;;  %s362_s28 = sshll.u32 (!%p125_p3), %s689_s26, 5 }
  0x33   : > { %s131_s3 = scalar_lea.sflag (!%p125_p3), [#allocation3], %s689_s26  ;;  %s134_s4 = scalar_lea.vmem (!%p125_p3), [#allocation2], %s362_s28 }
  0x39   : > { %531 = dma.done.wait (%p624_p8), %s131_s3, 512  }
  0x3a   : > { %533 = vsyncadd (%p624_p8), %s131_s3, 4294966784  ;;  %v155_v0 = vld [vmem:[%s134_s4] sm:$0xff]  ;;  %v156_v1 = vld [vmem:[%s134_s4 + $0x8] sm:$0xff]  ;;  %v185_v12 = vlaneseq  ;;  %s363_s18 = sshll.u32 %s689_s26, 1  ;;  %s370_s30 = sshll.u32 %s552_s9, 5 }
  0x3b   : > { %v157_v2 = vld [vmem:[%s134_s4 + $0x10] sm:$0xff]  ;;  %v158_v3 = vld [vmem:[%s134_s4 + $0x18] sm:$0xff]  ;;  %s152_s27 = scalar_lea.vmem [#allocation5], %s363_s18  ;;  %s711_s12 = scalar_lea.hbm %s759_s1, %s370_s30 }
  0x3c   : > { %v159_v4 = vmax.f32 %v155_v0, %v157_v2  ;;  %v166_v5 = vmax.f32 %v156_v1, %v158_v3  ;;  %v698_v17 = vshrl.u32 %v185_v12, 7  ;;  %s270_s29 = sshll.u32 %s152_s27, 4  ;;  %vm250_vm0 = vcmp.lt.s32.totalorder %v185_v12, 256  ;;  %s254_s13 = scalar_lea.sflag [#allocation4], %s689_s26  ;;  %s706_s29 = int_to_ptr.vmem [resolvable:$true] %s270_s29 }
  0x3d   : > { %s478_s15 = scalar_lea.vmem %s706_s29, 32  ;;  %p767_p9 = scmp.ne.s32.totalorder %s763_s19, 0 }
  0x3e   : > { %v160_v6 = vrot.slane %v159_v4, 4  ;;  %v167_v7 = vrot.slane %v166_v5, 4  ;;  %v187_v24 = vadd.s32 8, %v698_v17  ;;  %v188_v29 = vcvt.s32.f32 %v698_v17  ;;  %p479_p8 = scmp.ne.s32.totalorder %s706_s29, %s478_s15  ;;  %s566_s9 = smov [#allocation5]  }
  0x3f   : > { %s482_s16 = sshll.u32 %s566_s9, 4  ;;  %s483_s16 = int_to_ptr.vmem [resolvable:$false] %s482_s16 }
  0x40   : > { %v161_v8 = vmax.f32 %v159_v4, %v160_v6  ;;  %v168_v9 = vmax.f32 %v166_v5, %v167_v7  ;;  %v189_v30 = vcvt.s32.f32 %v187_v24  ;;  %v190_v31 = vmul.f32 0.066, %v188_v29  ;;  %p480_p11 = pnand %p479_p8, %p767_p9  ;;  %s484_s17 = scalar_lea.vmem %s483_s16, 64 }
  0x41   : > { %v565_v5 = vmov 1966171168   ;;  %p485_p6 = scmp.lt.s32.totalorder %s706_s29, %s483_s16  ;;  %p486_p13 = scmp.lt.s32.totalorder %s484_s17, %s478_s15 }
  0x42   : > { %v162_v10 = vrot.slane %v161_v8, 2  ;;  %v169_v11 = vrot.slane %v168_v9, 2  ;;  %v191_v32 = vmul.f32 0.066, %v189_v30  ;;  %v192_v33 = vadd.f32 0.01, %v190_v31  ;;  %p481_p0 = pneg %p480_p11 }
  0x43   : > { %v234_v6 = vunpack.c.l.s4 %v565_v5  ;;  %p487_p2 = por %p486_p13, %p485_p6 }
  0x44   : > { %v163_v13 = vmax.f32 %v161_v8, %v162_v10  ;;  %v170_v14 = vmax.f32 %v168_v9, %v169_v11  ;;  %v193_v34 = vadd.f32 0.01, %v191_v32 }
  0x45   : > { %v235_v9 = vunpack.c.0.s8 %v234_v6  ;;  %p488_p5 = pnand %p487_p2, %p481_p0 }
  0x46   : > { %v164_v15 = vrot.slane %v163_v13, 1  ;;  %v171_v16 = vrot.slane %v170_v14, 1 }
  0x48   : > { %v165_v18 = vmax.f32 %v163_v13, %v164_v15  ;;  %v172_v19 = vmax.f32 %v170_v14, %v171_v16  ;;  %v238_v15 = vsub.s32 %v235_v9, %v698_v17 }
  0x4a   : > { %v173_v20 = vsub.f32 %v155_v0, %v165_v18  ;;  %v175_v21 = vsub.f32 %v157_v2, %v165_v18  ;;  %v174_v22 = vsub.f32 %v156_v1, %v172_v19  ;;  %v176_v23 = vsub.f32 %v158_v3, %v172_v19 }
  0x4c   : > { %v177_v25 = vmul.f32 1.442695, %v173_v20  ;;  %v181_v26 = vmul.f32 1.442695, %v175_v21  ;;  %v179_v27 = vmul.f32 1.442695, %v174_v22 }
  0x4d   : > { %v183_v28 = vmul.f32 1.442695, %v176_v23 }
  0x4e   : > { %436 = vpow2.f32 %v177_v25 }
  0x4f   : > { %438 = vpow2.f32 %v179_v27 }
  0x50   : > { %440 = vpow2.f32 %v181_v26 }
  0x51   : > { %442 = vpow2.f32 %v183_v28 }
  0x58   : > { %v437_v35 = vpop.eup %436 }
  0x59   : > { %v439_v36 = vpop.eup %438  ;;  %v194_v37 = vmul.f32 %v437_v35, %v192_v33 }
  0x5a   : > { %v441_v38 = vpop.eup %440  ;;  %v195_v39 = vmul.f32 %v439_v36, %v192_v33 }
  0x5b   : > { %v443_v40 = vpop.eup %442  ;;  %v196_v41 = vmul.f32 %v441_v38, %v193_v34  ;;  %v212_v42 = vadd.f32 %v441_v38, %v437_v35 }
  0x5c   : > { %v197_v43 = vmul.f32 %v443_v40, %v193_v34  ;;  %v219_v44 = vadd.f32 %v443_v40, %v439_v36 }
  0x5d   : > { %v198_v45 = vadd.f32 %v196_v41, %v194_v37  ;;  %v213_v46 = vrot.slane %v212_v42, 4 }
  0x5e   : > { %v205_v47 = vadd.f32 %v197_v43, %v195_v39  ;;  %v220_v48 = vrot.slane %v219_v44, 4 }
  0x5f   : > { %v199_v49 = vrot.slane %v198_v45, 4  ;;  %v214_v50 = vadd.f32 %v213_v46, %v212_v42 }
  0x60   : > { %v206_v51 = vrot.slane %v205_v47, 4  ;;  %v221_v52 = vadd.f32 %v220_v48, %v219_v44 }
  0x61   : > { %v200_v53 = vadd.f32 %v199_v49, %v198_v45  ;;  %v215_v54 = vrot.slane %v214_v50, 2 }
  0x62   : > { %v207_v55 = vadd.f32 %v206_v51, %v205_v47  ;;  %v222_v56 = vrot.slane %v221_v52, 2 }
  0x63   : > { %v216_v57 = vadd.f32 %v215_v54, %v214_v50  ;;  %v201_v58 = vrot.slane %v200_v53, 2 }
  0x64   : > { %v223_v59 = vadd.f32 %v222_v56, %v221_v52  ;;  %v208_v60 = vrot.slane %v207_v55, 2 }
  0x65   : > { %v217_v61 = vrot.slane %v216_v57, 1  ;;  %v202_v0 = vadd.f32 %v201_v58, %v200_v53 }
  0x66   : > { %v224_v62 = vrot.slane %v223_v59, 1  ;;  %v209_v2 = vadd.f32 %v208_v60, %v207_v55 }
  0x67   : > { %v218_v63 = vadd.f32 %v217_v61, %v216_v57  ;;  %v203_v3 = vrot.slane %v202_v0, 1 }
  0x68   : > { %v225_v1 = vadd.f32 %v224_v62, %v223_v59  ;;  %v210_v4 = vrot.slane %v209_v2, 1 }
  0x69   : > { %444 = vrcp.f32 %v218_v63  ;;  %v204_v7 = vadd.f32 %v203_v3, %v202_v0 }
  0x6a   : > { %446 = vrcp.f32 %v225_v1  ;;  %v211_v8 = vadd.f32 %v210_v4, %v209_v2 }
  0x73   : > { %v445_v10 = vpop.eup %444 }
  0x74   : > { %v447_v11 = vpop.eup %446  ;;  %v228_v13 = vmul.f32 %v445_v10, %v204_v7 }
  0x75   : > { %v229_v14 = vmul.f32 %v447_v11, %v211_v8 }
  0x77   : > { %v232_v16 = vcombine.low %v228_v13, %v229_v14 }
  0x79   : > { %v239_v18 = vrot.slane %v232_v16, %v238_v15 }
  0x7b   : > { %v246_v19 = vrot.slane %v239_v18, %v238_v15 }
  0x7d   : > { %252 = vst.msk [vmem:[%s152_s27] sm:$0x3] %vm250_vm0, %v246_v19 }
  0x7e   : > { %491 = shalt.err (!%p488_p5)
}
  0x7f   : > { %s492_s22 = scalar_lea.hbm %s711_s12, 32  ;;  %s496_s25 = scalar_lea.hbm %s759_s1, 64 }
  0x80   : > { %p493_p4 = scmp.ne.s32.totalorder %s711_s12, %s492_s22  ;;  %p497_p12 = scmp.lt.u32.totalorder %s711_s12, %s759_s1 }
  0x81   : > { %p498_p1 = scmp.lt.u32.totalorder %s496_s25, %s492_s22  ;;  %p500_p8 = scmp.lt.u32.totalorder %s492_s22, %s711_s12 }
  0x82   : > { %p494_p7 = pnand %p493_p4, %p767_p9 }
  0x83   : > { %p499_p3 = por %p498_p1, %p497_p12 }
  0x84   : > { %p495_p10 = pneg %p494_p7 }
  0x85   : > { %p501_p11 = por %p500_p8, %p499_p3 }
  0x87   : > { %p502_p0 = pnand %p501_p11, %p495_p10 }
  0x89   : > { %505 = shalt.err (!%p502_p0)
}
  0x8a   : > { %373 = dma.vmem_to_hbm [thread:$0]  (%p767_p9), %s706_s29, 32, %s711_s12, %s254_s13  }
  0x8b PF: > { %s282_s3 = sand.u32 1, %s540_s6   ;;  %p768_p6 = scmp.ne.s32.totalorder %s764_s21, 0 }
  0x8c   : > { %p769_p13 = scmp.ge.s32.totalorder %s560_s11, 2  ;;  %s283_s4 = scalar_lea.sflag [#allocation4], %s282_s3 }
  0x8e   : > { %p380_p2 = pnand %p769_p13, %p768_p6 }
  0x90   : > { %535 = dma.done.wait (!%p380_p2), %s283_s4, 32  }
  0x91   : > { %537 = vsyncadd (!%p380_p2), %s283_s4, 4294967264  ;;  %s17_s11 = sadd.s32 1, %s560_s11   ;;  %s770_s6 = smov %s544_s7 }
  0x92   : > { %p14_p5 = scmp.ge.s32.totalorder %s17_s11, 4   ;;  %s771_s7 = smov %s548_s8 }
  0x93   : > { %s772_s8 = smov %s633_s20  ;;  %s773_s9 = smov %s556_s10 }
  0x94   : > { %s774_s10 = smov %s776_s14  ;;  %16 = sbr.rel (!%p14_p5) target bundleno = 6 (0x6), region = 69 }
  0x9b   :  { %288 = vsyncpa [#allocation3], 1 }
  0x9c   :  { %290 = vsyncpa [#allocation3 + $0x1], 1 }
  0x9d   :  { %291 = vsyncpa [#allocation4], 1 }
  0x9e   :  { %293 = vsyncpa [#allocation4 + $0x1], 1 }

</bundles_post_ra>
